<compile_context>
chip_gen: v5e
topology: v5e:2x2
jax: 0.10.0
libtpu: 0.0.40
codegen_flags: <defaults>
</compile_context>

<pallas_src>
import jax
import jax.numpy as jnp
from jax.experimental import pallas as pl
from jax.experimental.pallas import tpu as pltpu


def _round_up(v, m):
    return ((v + m - 1) // m) * m


def _gcn_fc_kernel(a_ref, x_ref, w1_ref, b1_ref, w2_ref, b2_ref, o_ref, acc_ref):
    k = pl.program_id(1)

    @pl.when(k == 0)
    def _init():
        acc_ref[...] = jnp.zeros_like(acc_ref)

    # agg += A_tile @ X_strip      (TM, TK) @ (TK, F) -> (TM, F), bf16 in / f32 acc
    acc_ref[...] += jnp.dot(a_ref[...], x_ref[...],
                            preferred_element_type=jnp.float32)

    @pl.when(k == pl.num_programs(1) - 1)
    def _epilogue():
        # GraphConv linear + bias, ReLU, output Linear + bias (all VMEM-resident).
        h = jnp.dot(acc_ref[...], w1_ref[...],
                    preferred_element_type=jnp.float32) + b1_ref[...]
        h = jnp.maximum(h, 0.0)
        out = jnp.dot(h, w2_ref[...],
                      preferred_element_type=jnp.float32) + b2_ref[...]
        o_ref[...] = out.astype(o_ref.dtype)


def gcn_1_layer_fc(a_norm, x, w1, b1, w2, b2, *, tm=1024, tk=1024):
    """a_norm: (N,N) normalized adjacency; x: (N,F); w1: (F,H); b1: (H,)|(1,H);
       w2: (H,C); b2: (C,)|(1,C).  Returns (N,C) float32."""
    n, f = x.shape
    h = w1.shape[1]
    c = w2.shape[1]

    w1 = w1.astype(jnp.float32)
    w2 = w2.astype(jnp.float32)
    b1 = jnp.reshape(b1, (1, -1)).astype(jnp.float32)
    b2 = jnp.reshape(b2, (1, -1)).astype(jnp.float32)
    x = x.astype(jnp.float32)
    a_norm = a_norm.astype(jnp.float32)

    # DGL-style order switch: apply weight before aggregation when F > H so the
    # N^2 matmul inner width is min(F, H).  (Bias is still applied post-agg.)
    if f > h:
        x = jnp.dot(x, w1)
        w1 = jnp.eye(h, dtype=jnp.float32)
        f = h

    # Lane-pad hidden / class dims to 128 (zero pad is exact).
    hp = _round_up(h, 128)
    cp = _round_up(c, 128)
    w1p = jnp.zeros((f, hp), jnp.float32).at[:, :h].set(w1)
    b1p = jnp.zeros((1, hp), jnp.float32).at[:, :h].set(b1)
    w2p = jnp.zeros((hp, cp), jnp.float32).at[:h, :c].set(w2)
    b2p = jnp.zeros((1, cp), jnp.float32).at[:, :c].set(b2)

    # Tile sizes: clamp to the (padded) problem, keep (8, 128) alignment.
    tm = min(tm, _round_up(n, 8))
    tk = min(tk, _round_up(n, 128))
    n_rows = _round_up(n, tm)
    n_cols = _round_up(n, tk)

    # Zero-pad A / X to the tile grid; cast the big operands to bf16.
    a_pad = jnp.zeros((n_rows, n_cols), jnp.float32).at[:n, :n].set(a_norm)
    x_pad = jnp.zeros((n_cols, f), jnp.float32).at[:n, :].set(x)
    a_pad = a_pad.astype(jnp.bfloat16)
    x_pad = x_pad.astype(jnp.bfloat16)

    grid = (n_rows // tm, n_cols // tk)

    out_padded = pl.pallas_call(
        _gcn_fc_kernel,
        out_shape=jax.ShapeDtypeStruct((n_rows, cp), jnp.float32),
        grid_spec=pltpu.PrefetchScalarGridSpec(
            num_scalar_prefetch=0,
            grid=grid,
            in_specs=[
                pl.BlockSpec((tm, tk), lambda i, k: (i, k)),   # A tile (pipelined)
                pl.BlockSpec((tk, f), lambda i, k: (k, 0)),    # X strip (pipelined)
                pl.BlockSpec((f, hp), lambda i, k: (0, 0)),    # W1 (resident)
                pl.BlockSpec((1, hp), lambda i, k: (0, 0)),    # b1 (resident)
                pl.BlockSpec((hp, cp), lambda i, k: (0, 0)),   # W2 (resident)
                pl.BlockSpec((1, cp), lambda i, k: (0, 0)),    # b2 (resident)
            ],
            out_specs=pl.BlockSpec((tm, cp), lambda i, k: (i, 0)),
            scratch_shapes=[pltpu.VMEM((tm, f), jnp.float32)],  # agg accumulator
        ),
        compiler_params=pltpu.CompilerParams(
            dimension_semantics=("parallel", "arbitrary"),
            vmem_limit_bytes=48 * 1024 * 1024,
        ),
    )(a_pad, x_pad, w1p, b1p, w2p, b2p)

    return out_padded[:n, :c]


def build_normalized_adjacency(adj):
    """DGL GraphConv norm='both': A_norm[i,j] = d_in[i]^{-1/2} * A[i,j] * d_out[j]^{-1/2}."""
    in_deg = jnp.sum(adj, axis=1)
    out_deg = jnp.sum(adj, axis=0)
    d_in = jnp.power(jnp.maximum(in_deg, 1.0), -0.5)
    d_out = jnp.power(jnp.maximum(out_deg, 1.0), -0.5)
    return d_in[:, None] * adj * d_out[None, :]


def _reference(a_norm, x, w1, b1, w2, b2):
    # Same bf16 rounding of the big operands as the kernel; f32 math otherwise.
    a = a_norm.astype(jnp.bfloat16).astype(jnp.float32)
    xb = x.astype(jnp.bfloat16).astype(jnp.float32)
    h = jnp.maximum((a @ xb) @ w1 + jnp.reshape(b1, (1, -1)), 0.0)
    return h @ w2 + jnp.reshape(b2, (1, -1))


if __name__ == "__main__":
    # Shapes consistent with the module: N nodes, in_feats, h1_size, num_classes.
    N, IN_FEATS, H1, NUM_CLASSES = 16, 8, 32, 4

    key = jax.random.PRNGKey(0)
    k_adj, k_x, k_w1, k_b1, k_w2, k_b2 = jax.random.split(key, 6)

    # Synthetic directed graph + self-loops (guarantees nonzero in-degree).
    adj = (jax.random.uniform(k_adj, (N, N)) < 0.25).astype(jnp.float32)
    adj = jnp.maximum(adj, jnp.eye(N, dtype=jnp.float32))
    a_norm = build_normalized_adjacency(adj)

    x = jax.random.normal(k_x, (N, IN_FEATS), dtype=jnp.float32)
    # GraphConv weight (F,H)+bias(H); Linear weight stored transposed as (H,C)+bias(C).
    w1 = jax.random.normal(k_w1, (IN_FEATS, H1), dtype=jnp.float32) * 0.1
    b1 = jax.random.normal(k_b1, (1, H1), dtype=jnp.float32) * 0.1
    w2 = jax.random.normal(k_w2, (H1, NUM_CLASSES), dtype=jnp.float32) * 0.1
    b2 = jax.random.normal(k_b2, (1, NUM_CLASSES), dtype=jnp.float32) * 0.1

    out = gcn_1_layer_fc(a_norm, x, w1, b1, w2, b2)
    out = jax.block_until_ready(out)
    ref = _reference(a_norm, x, w1, b1, w2, b2)
    assert out.shape == (N, NUM_CLASSES)
    assert jnp.allclose(out, ref, atol=1e-2, rtol=1e-2), \
        float(jnp.max(jnp.abs(out - ref)))

    # Multi-tile check: small tiles force grid=(2, 2) so the k-accumulation and
    # the pl.when init/epilogue gating (plus row padding) are exercised.
    N2 = 200
    k_adj2, k_x2 = jax.random.split(jax.random.PRNGKey(1), 2)
    adj2 = (jax.random.uniform(k_adj2, (N2, N2)) < 0.05).astype(jnp.float32)
    adj2 = jnp.maximum(adj2, jnp.eye(N2, dtype=jnp.float32))
    a2 = build_normalized_adjacency(adj2)
    x2 = jax.random.normal(k_x2, (N2, IN_FEATS), dtype=jnp.float32)

    out2 = gcn_1_layer_fc(a2, x2, w1, b1, w2, b2, tm=128, tk=128)
    out2 = jax.block_until_ready(out2)
    ref2 = _reference(a2, x2, w1, b1, w2, b2)
    assert out2.shape == (N2, NUM_CLASSES)
    assert jnp.allclose(out2, ref2, atol=1e-2, rtol=1e-2), \
        float(jnp.max(jnp.abs(out2 - ref2)))

    print("KERNEL_OK")
</pallas_src>

<mosaic_0001>
module attributes {stable_mosaic.version = 11 : i64} {
  func.func @_gcn_fc_kernel(%arg0: i32, %arg1: i32, %arg2: memref<16x128xbf16, #tpu.memory_space<vmem>>, %arg3: memref<128x8xbf16, #tpu.memory_space<vmem>>, %arg4: memref<8x128xf32, #tpu.memory_space<vmem>>, %arg5: memref<1x128xf32, #tpu.memory_space<vmem>>, %arg6: memref<128x128xf32, #tpu.memory_space<vmem>>, %arg7: memref<1x128xf32, #tpu.memory_space<vmem>>, %arg8: memref<16x128xf32, #tpu.memory_space<vmem>>, %arg9: memref<16x8xf32, #tpu.memory_space<vmem>>) attributes {dimension_semantics = [#tpu.dimension_semantics<parallel>, #tpu.dimension_semantics<arbitrary>], iteration_bounds = array<i64: 1, 1>, scalar_prefetch = 0 : i64, scratch_operands = 1 : i64, tpu.core_type = #tpu.core_type<tc>, window_params = [{transform_indices = @transform_0, window_bounds = array<i64: 16, 128>}, {transform_indices = @transform_1, window_bounds = array<i64: 128, 8>}, {pipeline_mode = #tpu.pipeline_mode<synchronous>, transform_indices = @transform_2, window_bounds = array<i64: 8, 128>}, {pipeline_mode = #tpu.pipeline_mode<synchronous>, transform_indices = @transform_3, window_bounds = array<i64: 1, 128>}, {pipeline_mode = #tpu.pipeline_mode<synchronous>, transform_indices = @transform_4, window_bounds = array<i64: 128, 128>}, {pipeline_mode = #tpu.pipeline_mode<synchronous>, transform_indices = @transform_5, window_bounds = array<i64: 1, 128>}, {transform_indices = @transform_6, window_bounds = array<i64: 16, 128>}]} {
    %c0_i32 = arith.constant 0 : i32
    %0 = arith.cmpi eq, %arg1, %c0_i32 : i32
    %1 = arith.extui %0 : i1 to i32
    %c0_i32_0 = arith.constant 0 : i32
    %2 = arith.cmpi ne, %1, %c0_i32_0 : i32
    scf.if %2 {
      %cst_10 = arith.constant 0.000000e+00 : f32
      %12 = vector.broadcast %cst_10 : f32 to vector<16x8xf32>
      %c0_11 = arith.constant 0 : index
      %c0_12 = arith.constant 0 : index
      %13 = vector.load %arg9[%c0_11, %c0_12] : memref<16x8xf32, #tpu.memory_space<vmem>>, vector<16x8xf32>
      tpu.vector_store %arg9[%c0_11, %c0_12], %12 {strides = array<i32>} : memref<16x8xf32, #tpu.memory_space<vmem>>, vector<16x8xf32>,
    } else {
    }
    %c0 = arith.constant 0 : index
    %c0_1 = arith.constant 0 : index
    %3 = vector.load %arg9[%c0, %c0_1] : memref<16x8xf32, #tpu.memory_space<vmem>>, vector<16x8xf32>
    %c0_2 = arith.constant 0 : index
    %c0_3 = arith.constant 0 : index
    %4 = vector.load %arg2[%c0_2, %c0_3] : memref<16x128xbf16, #tpu.memory_space<vmem>>, vector<16x128xbf16>
    %c0_4 = arith.constant 0 : index
    %c0_5 = arith.constant 0 : index
    %5 = vector.load %arg3[%c0_4, %c0_5] : memref<128x8xbf16, #tpu.memory_space<vmem>>, vector<128x8xbf16>
    %cst = arith.constant dense<0.000000e+00> : vector<16x8xf32>
    %6 = tpu.matmul %4, %5, %cst {dimension_numbers = #tpu.dot_dimension_numbers<[1], [0], [0], [1], [0, 0, 1, 1], [], []>} : vector<16x128xbf16>, vector<128x8xbf16>, vector<16x8xf32> -> vector<16x8xf32>
    %7 = arith.addf %3, %6 : vector<16x8xf32>
    %c0_6 = arith.constant 0 : index
    %c0_7 = arith.constant 0 : index
    %8 = vector.load %arg9[%c0_6, %c0_7] : memref<16x8xf32, #tpu.memory_space<vmem>>, vector<16x8xf32>
    tpu.vector_store %arg9[%c0_6, %c0_7], %7 {strides = array<i32>} : memref<16x8xf32, #tpu.memory_space<vmem>>, vector<16x8xf32>,
    %c0_i32_8 = arith.constant 0 : i32
    %9 = arith.cmpi eq, %arg1, %c0_i32_8 : i32
    %10 = arith.extui %9 : i1 to i32
    %c0_i32_9 = arith.constant 0 : i32
    %11 = arith.cmpi ne, %10, %c0_i32_9 : i32
    scf.if %11 {
      %c0_10 = arith.constant 0 : index
      %c0_11 = arith.constant 0 : index
      %12 = vector.load %arg9[%c0_10, %c0_11] : memref<16x8xf32, #tpu.memory_space<vmem>>, vector<16x8xf32>
      %c0_12 = arith.constant 0 : index
      %c0_13 = arith.constant 0 : index
      %13 = vector.load %arg4[%c0_12, %c0_13] : memref<8x128xf32, #tpu.memory_space<vmem>>, vector<8x128xf32>
      %cst_14 = arith.constant dense<0.000000e+00> : vector<16x128xf32>
      %14 = tpu.matmul %12, %13, %cst_14 {dimension_numbers = #tpu.dot_dimension_numbers<[1], [0], [0], [1], [0, 0, 1, 1], [], []>} : vector<16x8xf32>, vector<8x128xf32>, vector<16x128xf32> -> vector<16x128xf32>
      %c0_15 = arith.constant 0 : index
      %c0_16 = arith.constant 0 : index
      %15 = vector.load %arg5[%c0_15, %c0_16] : memref<1x128xf32, #tpu.memory_space<vmem>>, vector<1x128xf32>
      %16 = vector.broadcast %15 : vector<1x128xf32> to vector<16x128xf32>
      %17 = arith.addf %14, %16 : vector<16x128xf32>
      %cst_17 = arith.constant 0.000000e+00 : f32
      %18 = vector.broadcast %cst_17 : f32 to vector<16x128xf32>
      %19 = arith.maximumf %17, %18 : vector<16x128xf32>
      %c0_18 = arith.constant 0 : index
      %c0_19 = arith.constant 0 : index
      %20 = vector.load %arg6[%c0_18, %c0_19] : memref<128x128xf32, #tpu.memory_space<vmem>>, vector<128x128xf32>
      %cst_20 = arith.constant dense<0.000000e+00> : vector<16x128xf32>
      %21 = tpu.matmul %19, %20, %cst_20 {dimension_numbers = #tpu.dot_dimension_numbers<[1], [0], [0], [1], [0, 0, 1, 1], [], []>} : vector<16x128xf32>, vector<128x128xf32>, vector<16x128xf32> -> vector<16x128xf32>
      %c0_21 = arith.constant 0 : index
      %c0_22 = arith.constant 0 : index
      %22 = vector.load %arg7[%c0_21, %c0_22] : memref<1x128xf32, #tpu.memory_space<vmem>>, vector<1x128xf32>
      %23 = vector.broadcast %22 : vector<1x128xf32> to vector<16x128xf32>
      %24 = arith.addf %21, %23 : vector<16x128xf32>
      %c0_23 = arith.constant 0 : index
      %c0_24 = arith.constant 0 : index
      %25 = vector.load %arg8[%c0_23, %c0_24] : memref<16x128xf32, #tpu.memory_space<vmem>>, vector<16x128xf32>
      tpu.vector_store %arg8[%c0_23, %c0_24], %24 {strides = array<i32>} : memref<16x128xf32, #tpu.memory_space<vmem>>, vector<16x128xf32>,
    } else {
    }
    return
  }
  func.func @transform_0(%arg0: i32, %arg1: i32) -> (i32, i32) {
    %c0_i32 = arith.constant 0 : i32
    return %arg0, %arg1 : i32, i32
  }
  func.func @transform_1(%arg0: i32, %arg1: i32) -> (i32, i32) {
    %c0_i32 = arith.constant 0 : i32
    %c0_i32_0 = arith.constant 0 : i32
    return %arg1, %c0_i32 : i32, i32
  }
  func.func @transform_2(%arg0: i32, %arg1: i32) -> (i32, i32) {
    %c0_i32 = arith.constant 0 : i32
    %c0_i32_0 = arith.constant 0 : i32
    %c0_i32_1 = arith.constant 0 : i32
    return %c0_i32, %c0_i32_0 : i32, i32
  }
  func.func @transform_3(%arg0: i32, %arg1: i32) -> (i32, i32) {
    %c0_i32 = arith.constant 0 : i32
    %c0_i32_0 = arith.constant 0 : i32
    %c0_i32_1 = arith.constant 0 : i32
    return %c0_i32, %c0_i32_0 : i32, i32
  }
  func.func @transform_4(%arg0: i32, %arg1: i32) -> (i32, i32) {
    %c0_i32 = arith.constant 0 : i32
    %c0_i32_0 = arith.constant 0 : i32
    %c0_i32_1 = arith.constant 0 : i32
    return %c0_i32, %c0_i32_0 : i32, i32
  }
  func.func @transform_5(%arg0: i32, %arg1: i32) -> (i32, i32) {
    %c0_i32 = arith.constant 0 : i32
    %c0_i32_0 = arith.constant 0 : i32
    %c0_i32_1 = arith.constant 0 : i32
    return %c0_i32, %c0_i32_0 : i32, i32
  }
  func.func @transform_6(%arg0: i32, %arg1: i32) -> (i32, i32) {
    %c0_i32 = arith.constant 0 : i32
    %c0_i32_0 = arith.constant 0 : i32
    return %arg0, %c0_i32 : i32, i32
  }
}

</mosaic_0001>

<bundles_post_ra>
// kernel: tpu_custom_call.1
= control target key start
LH: loop header
LB: loop body
LE: loop exit
PB: predicated region body
PF: predicated region fallthrough
CT: control target
= control target key end

     0   :  { %11 = vsyncpa [#allocation4], 0  ;;  %s445_s0 = inlined_call_operand.vmem [shape: bf16[16,128], index: 0, kind: input, shape index: {}]   ;;  %s446_s1 = inlined_call_operand.vmem [shape: bf16[128,8], index: 1, kind: input, shape index: {}]   ;;  %s447_s2 = inlined_call_operand.vmem [shape: f32[8,128], index: 2, kind: input, shape index: {}]   ;;  %s448_s3 = inlined_call_operand.vmem [shape: f32[1,128], index: 3, kind: input, shape index: {}]   ;;  %s449_s4 = inlined_call_operand.hbm [shape: f32[128,128], index: 4, kind: input, shape index: {}]   ;;  %s450_s5 = inlined_call_operand.vmem [shape: f32[1,128], index: 5, kind: input, shape index: {}]   ;;  %s451_s6 = inlined_call_operand.hbm [shape: f32[16,128], index: 6, kind: output, shape index: {}]  }
   0x1   :  { %12 = vsyncpa [#allocation5], 0  ;;  %s25_s23 = sshll.u32 %s449_s4, 4  ;;  %s351_s24 = smov [#allocation3]   ;;  %s26_s23 = int_to_ptr.hbm [resolvable:$true] %s25_s23 }
   0x2   :  { %s27_s25 = sshll.u32 %s351_s24, 4  ;;  %s352_s26 = smov 128   ;;  %s28_s25 = int_to_ptr.vmem [resolvable:$true] %s27_s25 }
   0x3   :  { %s353_s27 = smov 8  }
   0x4   :  { %33 = dma.hbm_to_vmem [thread:$0]  %s26_s23, 2048, %s28_s25, [#allocation4], %s352_s26, %s352_s26, %s353_s27  }
   0x5   :  { %347 = dma.done.wait [#allocation4], 2048  }
   0x6   :  { %348 = vsyncadd [#allocation4], 4294965248  ;;  %v291_v0 = vld [vmem:[%s446_s1 + $0x38] sm:$0xff]  ;;  %vm44_vm0 = vcmask 64512   ;;  %v290_v1 = vld [vmem:[%s446_s1 + $0x30] sm:$0xff]  ;;  %v354_v2 = vmov 0.0  }
   0x7   :  { %121 = vmatpush.bf16.msra.mxu0 %v291_v0  ;;  %45 = vst.msk [vmem:[#allocation2] sm:$0xff] %vm44_vm0, %v354_v2  ;;  %v289_v3 = vld [vmem:[%s446_s1 + $0x28] sm:$0xff]  ;;  %v288_v4 = vld [vmem:[%s446_s1 + $0x20] sm:$0xff]  ;;  %v287_v5 = vld [vmem:[%s446_s1 + $0x18] sm:$0xff]  ;;  %s355_s24 = smov [#allocation6]  }
   0x8   :  { %46 = vst.msk [vmem:[#allocation2 + $0x8] sm:$0xff] %vm44_vm0, %v354_v2  ;;  %v286_v6 = vld [vmem:[%s446_s1 + $0x10] sm:$0xff]  ;;  %v285_v7 = vld [vmem:[%s446_s1 + $0x8] sm:$0xff]  ;;  %v284_v8 = vld [vmem:[%s446_s1] sm:$0xff]  ;;  %s230_s25 = sshll.u32 %s355_s24, 4  ;;  %s231_s25 = int_to_ptr.vmem [resolvable:$true] %s230_s25 }
   0x9   :  { %v283_v9 = vld [vmem:[%s445_s0] sm:$0xff]  ;;  %v196_v11 = vld [vmem:[#allocation3 + $0x78] sm:$0xff]  ;;  %v194_v13 = vld [vmem:[#allocation3 + $0x68] sm:$0xff] }
   0xa   :  { %v145_v10 = vld [vmem:[%s447_s2] sm:$0xff]  ;;  %201 = vmatpush.msra.mxu2 %v196_v11  ;;  %v193_v14 = vld [vmem:[#allocation3 + $0x60] sm:$0xff]  ;;  %v192_v15 = vld [vmem:[#allocation3 + $0x58] sm:$0xff] }
   0xb   :  { %122 = vmatpush.bf16.msra.mxu0 %v290_v1  ;;  %171 = vmatpush.msra.mxu1 %v145_v10  ;;  %v195_v12 = vld [vmem:[#allocation3 + $0x70] sm:$0xff]  ;;  %v190_v17 = vld [vmem:[#allocation3 + $0x48] sm:$0xff]  ;;  %v189_v19 = vld [vmem:[#allocation3 + $0x40] sm:$0xff] }
   0xc   :  { %202 = vmatpush.msra.mxu2 %v195_v12  ;;  %v191_v16 = vld [vmem:[#allocation3 + $0x50] sm:$0xff]  ;;  %v188_v22 = vld [vmem:[#allocation3 + $0x38] sm:$0xff]  ;;  %v186_v24 = vld [vmem:[#allocation3 + $0x28] sm:$0xff] }
   0xd   :  { %v187_v23 = vld [vmem:[#allocation3 + $0x30] sm:$0xff]  ;;  %v185_v26 = vld [vmem:[#allocation3 + $0x20] sm:$0xff]  ;;  %v184_v29 = vld [vmem:[#allocation3 + $0x18] sm:$0xff] }
   0xe   :  { %203 = vmatpush.msra.mxu2 %v194_v13  ;;  %v47_v18 = vld [vmem:[#allocation2] sm:$0xff]  ;;  %v182_v33 = vld [vmem:[#allocation3 + $0x8] sm:$0xff]  ;;  %v181_v34 = vld [vmem:[#allocation3] sm:$0xff] }
   0xf   :  { %123 = vmatpush.bf16.msra.mxu0 %v289_v3  ;;  %v48_v25 = vld [vmem:[#allocation2 + $0x8] sm:$0xff]  ;;  %v183_v32 = vld [vmem:[#allocation3 + $0x10] sm:$0xff] }
  0x10   :  { %204 = vmatpush.msra.mxu2 %v193_v14  ;;  %v297_v35 = vld [vmem:[%s448_s3] ss:$0 sm:$0xff]  ;;  %s232_s3 = sshll.u32 %s451_s6, 4  ;;  %s233_s3 = int_to_ptr.hbm [resolvable:$true] %s232_s3 }
  0x11   :  { %v298_v42 = vld [vmem:[%s450_s5] ss:$0 sm:$0xff] }
  0x12   :  { %205 = vmatpush.msra.mxu2 %v192_v15 }
  0x13   :  { %124 = vmatpush.bf16.msra.mxu0 %v288_v4 }
  0x14   :  { %206 = vmatpush.msra.mxu2 %v191_v16 }
  0x16   :  { %207 = vmatpush.msra.mxu2 %v190_v17 }
  0x17   :  { %125 = vmatpush.bf16.msra.mxu0 %v287_v5 }
  0x18   :  { %208 = vmatpush.msra.mxu2 %v189_v19 }
  0x1a   :  { %209 = vmatpush.msra.mxu2 %v188_v22 }
  0x1b   :  { %126 = vmatpush.bf16.msra.mxu0 %v286_v6 }
  0x1c   :  { %210 = vmatpush.msra.mxu2 %v187_v23 }
  0x1e   :  { %211 = vmatpush.msra.mxu2 %v186_v24 }
  0x1f   :  { %127 = vmatpush.bf16.msra.mxu0 %v285_v7 }
  0x20   :  { %212 = vmatpush.msra.mxu2 %v185_v26 }
  0x22   :  { %213 = vmatpush.msra.mxu2 %v184_v29 }
  0x23   :  { %128 = vmatpush.bf16.msra.mxu0 %v284_v8 }
  0x24   :  { %214 = vmatpush.msra.mxu2 %v183_v32 }
  0x26   :  { %129 = vmatmul.bf16.vlgmr.msra.gmra.mxu0 %v283_v9  ;;  %215 = vmatpush.msra.mxu2 %v182_v33 }
  0x28   :  { %216 = vmatpush.msra.mxu2 %v181_v34 }
  0xa3   :  { %v130_v20 = vpop.f32.mrf.mxu0 }
  0xa4   :  { %v135_v21 = vadd.f32 %v130_v20, %v47_v18 }
  0xa6   :  { %138 = vst.msk [vmem:[#allocation2] sm:$0xff] %vm44_vm0, %v135_v21 }
  0xab   :  { %v132_v27 = vpop.f32.mrf.mxu0 }
  0xac   :  { %v136_v28 = vadd.f32 %v132_v27, %v48_v25 }
  0xad   :  { %v143_v30 = vld [vmem:[#allocation2] sm:$0xff] }
  0xae   :  { %139 = vst.msk [vmem:[#allocation2 + $0x8] sm:$0xff] %vm44_vm0, %v136_v28  ;;  %281 = vmatmul.msk.f32.vlgmr.msra.gmra.mxu1 %vm44_vm0, %v143_v30 }
  0xb5   :  { %v144_v31 = vld [vmem:[#allocation2 + $0x8] sm:$0xff] }
  0xb6   :  { %282 = vmatmul.msk.f32.gmra.mxu1 %vm44_vm0, %v144_v31 }
 0x12b   :  { %v173_v36 = vpop.f32.mrf.mxu1 }
 0x12c   :  { %v174_v37 = vadd.f32 %v297_v35, %v173_v36 }
 0x12e   :  { %v179_v38 = vmax.f32 %v174_v37, 0.0 }
 0x130   :  { %217 = vmatmul.f32.vlgmr.msra.gmra.mxu2 %v179_v38 }
 0x133   :  { %v176_v39 = vpop.f32.mrf.mxu1 }
 0x134   :  { %v177_v40 = vadd.f32 %v297_v35, %v176_v39 }
 0x136   :  { %v180_v41 = vmax.f32 %v177_v40, 0.0 }
 0x138   :  { %220 = vmatmul.f32.gmra.mxu2 %v180_v41 }
 0x1b3   :  { %v218_v43 = vpop.f32.mrf.mxu2 }
 0x1b4   :  { %v219_v44 = vadd.f32 %v298_v42, %v218_v43 }
 0x1b6   :  { %224 = vst [vmem:[#allocation6] sm:$0xff] %v219_v44 }
 0x1bb   :  { %v221_v45 = vpop.f32.mrf.mxu2 }
 0x1bc   :  { %v222_v46 = vadd.f32 %v298_v42, %v221_v45 }
 0x1be   :  { %225 = vst [vmem:[#allocation6 + $0x8] sm:$0xff] %v222_v46 }
 0x1bf   :  { %238 = dma.vmem_to_hbm [thread:$0]  %s231_s25, 256, %s233_s3, [#allocation5], %s352_s26, %s352_s26, %s353_s27  }
 0x1c0   :  { %349 = dma.done.wait [#allocation5], 256  }
 0x1c1   :  { %350 = vsyncadd [#allocation5], 4294967040 }
 0x1c2   :  { %243 = vsyncpa [#allocation4], 1 }
 0x1c3   :  { %244 = vsyncpa [#allocation5], 1 }

</bundles_post_ra>
